<compile_context>
chip_gen: v6e
topology: v6e:2x2x1
jax: 0.10.0
libtpu: 0.0.40
codegen_flags: <defaults>
</compile_context>

<pallas_src>
import functools
import math

import jax
import jax.numpy as jnp
from jax import lax
from jax.experimental import pallas as pl
from jax.experimental.pallas import tpu as pltpu

DROPOUT_P = 0.2
TARGET_BLOCK_BYTES = 4 * 1024 * 1024    # ~4 MiB blocks: measured HBM-roofline plateau
MIN_GRID_STEPS = 8                      # keep >= 8 sequence grid steps when S allows
VMEM_LIMIT_BYTES = 48 * 1024 * 1024     # > v5e 16 MiB scoped default, < v7x 64 MiB physical


def make_pe_table(max_len: int, d_model: int, dtype=jnp.float32):
    """Sinusoidal PE table, identical to the PyTorch __init__ (shape (max_len, d_model))."""
    assert d_model % 2 == 0, "PositionalEncoder requires an even d_model"
    position = jnp.arange(max_len, dtype=jnp.float32)[:, None]              # (L, 1)
    div_term = jnp.exp(jnp.arange(0, d_model, 2, dtype=jnp.float32)
                       * (-math.log(10000.0) / d_model))                    # (D/2,)
    ang = position * div_term                                               # (L, D/2)
    pe = jnp.zeros((max_len, d_model), jnp.float32)
    pe = pe.at[:, 0::2].set(jnp.sin(ang))
    pe = pe.at[:, 1::2].set(jnp.cos(ang))
    return pe.astype(dtype)


def _dropout_scale(seed_ref, rows, cols, dtype, keep_prob, use_hw_prng):
    """(rows, cols) array equal to 1/keep_prob where kept and 0 where dropped."""
    threshold = jnp.int32(int(keep_prob * float(1 << 23)))        # 23-bit keep threshold
    if use_hw_prng:
        # v7x option: one hardware draw per element instead of the integer mix.
        pltpu.prng_seed(seed_ref[0], pl.program_id(0), pl.program_id(1))
        bits = pltpu.prng_random_bits((rows, cols))
        draw = (bits & 0x7FFFFF).astype(jnp.int32)                # 23 uniform bits
    else:
        # Per-tile scalar seed: user seed + grid position, mixed on the scalar
        # unit (free next to the vector path).
        tile = pl.program_id(0) * pl.num_programs(1) + pl.program_id(1)
        seed32 = (seed_ref[0].astype(jnp.uint32) * jnp.uint32(0x9E3779B1)
                  + tile.astype(jnp.uint32) * jnp.uint32(0x85EBCA6B))
        # Local element index + 2-round xorshift-multiply mix (pure VPU int ops).
        r = lax.broadcasted_iota(jnp.int32, (rows, cols), 0)
        c = lax.broadcasted_iota(jnp.int32, (rows, cols), 1)
        v = (r * jnp.int32(cols) + c).astype(jnp.uint32) + seed32
        v = (v ^ (v >> jnp.uint32(16))) * jnp.uint32(0x7FEB352D)
        v = (v ^ (v >> jnp.uint32(15))) * jnp.uint32(0x846CA68B)
        draw = (v >> jnp.uint32(9)).astype(jnp.int32)             # top 23 mixed bits
    keep = draw < threshold
    return keep.astype(dtype) * jnp.asarray(1.0 / keep_prob, dtype)


def _posenc_kernel(seed_ref, x_ref, pe_ref, o_ref, *, train, keep_prob, use_hw_prng):
    # x_ref/o_ref: (ts, B, td); pe_ref: (ts, 1, td) -> sublane broadcast over batch.
    y = x_ref[...] + pe_ref[...]
    if train:
        ts, b, td = y.shape
        scale = _dropout_scale(seed_ref, ts * b, td, y.dtype, keep_prob, use_hw_prng)
        y = y * scale.reshape(ts, b, td)      # fused mask + 1/keep_prob scale
    o_ref[...] = y.astype(o_ref.dtype)


def _choose_tiles(S, B, D, itemsize):
    """Pick (seq_tile, dmodel_tile) for ~4 MiB blocks and a never-trivial grid."""
    row_bytes = B * D * itemsize
    if row_bytes > TARGET_BLOCK_BYTES and D > 128:
        # A single (B, D) slab already blows the block budget: split d_model on
        # a second grid axis in 128-lane multiples (keeps stores lane-dense).
        td = ((TARGET_BLOCK_BYTES // (B * itemsize)) // 128) * 128
        td = max(128, min(td, D))
    else:
        td = D
    slab_bytes = B * td * itemsize
    ts = max(1, TARGET_BLOCK_BYTES // slab_bytes)
    # Keep >= MIN_GRID_STEPS sequence steps when S allows it, so the grid never
    # collapses to (1,) (v7x megacore sharding + DMA/compute pipelining).
    ts = min(ts, max(1, pl.cdiv(S, MIN_GRID_STEPS)))
    return min(ts, S), td


def positional_encoder(x, pe_table, *, seed: int = 0, train: bool = False,
                       use_hw_prng: bool = False):
    """y = dropout(x + pe[:S]).  x: (S, B, D); pe_table: (max_len, D).

    The dropout mask is a pure function of (seed, grid position, element
    index): pass a fresh `seed` every training step.
    """
    S, B, D = x.shape
    assert pe_table.shape[0] >= S and pe_table.shape[1] == D

    pe3 = pe_table[:S].astype(x.dtype).reshape(S, 1, D)     # tiny (S*D) HBM stream
    seed_arr = jnp.asarray([seed], dtype=jnp.int32)

    ts, td = _choose_tiles(S, B, D, x.dtype.itemsize)
    grid = (pl.cdiv(S, ts), pl.cdiv(D, td))

    kernel = functools.partial(_posenc_kernel, train=train,
                               keep_prob=1.0 - DROPOUT_P, use_hw_prng=use_hw_prng)

    return pl.pallas_call(
        kernel,
        out_shape=jax.ShapeDtypeStruct((S, B, D), x.dtype),
        grid=grid,
        in_specs=[
            pl.BlockSpec(memory_space=pltpu.MemorySpace.SMEM),      # seed scalar
            pl.BlockSpec((ts, B, td), lambda i, j: (i, 0, j)),      # x tile
            pl.BlockSpec((ts, 1, td), lambda i, j: (i, 0, j)),      # pe tile (no HBM bcast)
        ],
        out_specs=pl.BlockSpec((ts, B, td), lambda i, j: (i, 0, j)),
        compiler_params=pltpu.CompilerParams(
            dimension_semantics=("parallel", "parallel"),   # both axes independent
            vmem_limit_bytes=VMEM_LIMIT_BYTES,
        ),
        # NOTE: if profiling shows exposed DMA, add pipeline_mode=pl.Buffered(3)
        # on the x BlockSpec; with the pe stream removed this stays < 30 MiB.
    )(seed_arr, x, pe3)


if __name__ == "__main__":
    # Shape implied by the module's forward: (seq_len, batch, d_model).
    S, B, D = 8, 2, 32
    MAX_LEN = 64                         # module default is 5000; small here

    key = jax.random.PRNGKey(0)
    x = jax.random.normal(key, (S, B, D), dtype=jnp.float32)
    pe = make_pe_table(MAX_LEN, D)
    ref = x + pe[:S][:, None, :]

    # Eval mode (dropout = identity): exact match against the reference.
    out_eval = positional_encoder(x, pe, train=False)
    jax.block_until_ready(out_eval)
    assert out_eval.shape == (S, B, D)
    assert jnp.allclose(out_eval, ref, atol=1e-6), "eval-mode mismatch"

    # Training mode: in-kernel dropout (kept elements scaled by 1/0.8).
    keep_prob = 1.0 - DROPOUT_P
    out_train = positional_encoder(x, pe, seed=123, train=True)
    jax.block_until_ready(out_train)
    scaled = ref / keep_prob
    ok = jnp.logical_or(
        jnp.isclose(out_train, 0.0, atol=1e-6),
        jnp.isclose(out_train, scaled, atol=1e-5),
    )
    assert bool(jnp.all(ok)), "training-mode dropout values malformed"
    keep_frac = float(jnp.mean((jnp.abs(out_train) > 1e-6).astype(jnp.float32)))
    assert 0.5 < keep_frac < 0.99, f"implausible keep fraction {keep_frac}"

    # Second, lane-dense shape (d_model % 128 == 0 -> unmasked vst stores,
    # multi-row sequence tiles) to exercise the tiling logic.
    S2, B2, D2 = 64, 4, 256
    x2 = jax.random.normal(jax.random.PRNGKey(1), (S2, B2, D2), dtype=jnp.float32)
    pe2 = make_pe_table(128, D2)
    out2 = positional_encoder(x2, pe2, train=False)
    jax.block_until_ready(out2)
    assert jnp.allclose(out2, x2 + pe2[:S2][:, None, :], atol=1e-6), "lane-dense mismatch"

    print("KERNEL_OK")
</pallas_src>

<mosaic_0001>
module attributes {stable_mosaic.version = 11 : i64} {
  func.func @_posenc_kernel(%arg0: i32, %arg1: i32, %arg2: memref<1xi32, #tpu.memory_space<smem>>, %arg3: memref<1x2x32xf32, #tpu.memory_space<vmem>>, %arg4: memref<1x1x32xf32, #tpu.memory_space<vmem>>, %arg5: memref<1x2x32xf32, #tpu.memory_space<vmem>>) attributes {dimension_semantics = [#tpu.dimension_semantics<parallel>, #tpu.dimension_semantics<parallel>], iteration_bounds = array<i64: 8, 1>, scalar_prefetch = 0 : i64, scratch_operands = 0 : i64, tpu.core_type = #tpu.core_type<tc>, window_params = [{transform_indices = @transform_0, window_bounds = array<i64: 1>}, {transform_indices = @transform_1, window_bounds = array<i64: 1, 2, 32>}, {transform_indices = @transform_2, window_bounds = array<i64: 1, 1, 32>}, {transform_indices = @transform_3, window_bounds = array<i64: 1, 2, 32>}]} {
    %c0 = arith.constant 0 : index
    %c0_0 = arith.constant 0 : index
    %c0_1 = arith.constant 0 : index
    %0 = vector.load %arg3[%c0, %c0_0, %c0_1] : memref<1x2x32xf32, #tpu.memory_space<vmem>>, vector<1x2x32xf32>
    %c0_2 = arith.constant 0 : index
    %c0_3 = arith.constant 0 : index
    %c0_4 = arith.constant 0 : index
    %1 = vector.load %arg4[%c0_2, %c0_3, %c0_4] : memref<1x1x32xf32, #tpu.memory_space<vmem>>, vector<1x1x32xf32>
    %2 = vector.broadcast %1 : vector<1x1x32xf32> to vector<1x2x32xf32>
    %3 = arith.addf %0, %2 : vector<1x2x32xf32>
    %c0_5 = arith.constant 0 : index
    %c0_6 = arith.constant 0 : index
    %c0_7 = arith.constant 0 : index
    %4 = vector.load %arg5[%c0_5, %c0_6, %c0_7] : memref<1x2x32xf32, #tpu.memory_space<vmem>>, vector<1x2x32xf32>
    tpu.vector_store %arg5[%c0_5, %c0_6, %c0_7], %3 {strides = array<i32>} : memref<1x2x32xf32, #tpu.memory_space<vmem>>, vector<1x2x32xf32>,
    return
  }
  func.func @transform_0(%arg0: i32, %arg1: i32) -> i32 {
    %c0_i32 = arith.constant 0 : i32
    %c0_i32_0 = arith.constant 0 : i32
    return %c0_i32 : i32
  }
  func.func @transform_1(%arg0: i32, %arg1: i32) -> (i32, i32, i32) {
    %c0_i32 = arith.constant 0 : i32
    %c0_i32_0 = arith.constant 0 : i32
    return %arg0, %c0_i32, %arg1 : i32, i32, i32
  }
  func.func @transform_2(%arg0: i32, %arg1: i32) -> (i32, i32, i32) {
    %c0_i32 = arith.constant 0 : i32
    %c0_i32_0 = arith.constant 0 : i32
    return %arg0, %c0_i32, %arg1 : i32, i32, i32
  }
  func.func @transform_3(%arg0: i32, %arg1: i32) -> (i32, i32, i32) {
    %c0_i32 = arith.constant 0 : i32
    %c0_i32_0 = arith.constant 0 : i32
    return %arg0, %c0_i32, %arg1 : i32, i32, i32
  }
}

</mosaic_0001>

<bundles_post_ra>
// kernel: tpu_custom_call.1
= control target key start
LH: loop header
LB: loop body
LE: loop exit
PB: predicated region body
PF: predicated region fallthrough
CT: control target
= control target key end

     0   :  { %9 = vsyncpa [#allocation4], 0  ;;  %s777_s0 = inlined_call_operand.<no memory space> [shape: s32[1], index: 0, kind: input, shape index: {}]   ;;  %s778_s1 = inlined_call_operand.hbm [shape: f32[8,2,32], index: 1, kind: input, shape index: {}]   ;;  %s779_s2 = inlined_call_operand.hbm [shape: f32[8,1,32], index: 2, kind: input, shape index: {}]   ;;  %s780_s3 = inlined_call_operand.hbm [shape: f32[8,2,32], index: 3, kind: output, shape index: {}]  }
   0x1   :  { %11 = vsyncpa [#allocation4 + $0x1], 0 }
   0x2   :  { %12 = vsyncpa [#allocation7], 0 }
   0x3   :  { %14 = vsyncpa [#allocation7 + $0x1], 0 }
   0x4   :  { %15 = vsyncpa [#allocation5], 0 }
   0x5   :  { %17 = vsyncpa [#allocation5 + $0x1], 0  ;;  %s615_s12 = smov 0   ;;  %s617_s13 = smov 0  }
   0x6   :  { %s619_s0 = smov 0   ;;  %s621_s14 = smov 0  }
   0x7   :  { %s623_s15 = smov 0   ;;  %s625_s16 = smov 0  }
   0x8 LB: > { %s368_s17 = sadd.s32 4294967295, %s590_s16   ;;  %s369_s18 = sadd.s32 4294967294, %s590_s16   ;;  %s590_s16 = sphi %s625_s16, %s23_s16   ;;  %s586_s15 = sphi %s623_s15, %s791_s15   ;;  %s582_s14 = sphi %s621_s14, %s790_s14   ;;  %s578_s0 = sphi %s619_s0, %s789_s0   ;;  %s574_s13 = sphi %s617_s13, %s788_s13   ;;  %s570_s12 = sphi %s615_s12, %s787_s12  }
   0x9   : > { %s35_s19 = sadd.s32 1, %s586_s15  ;;  %s65_s20 = sadd.s32 1, %s578_s0 }
   0xa   : > { %p37_p0 = scmp.ge.s32.totalorder %s35_s19, 8  ;;  %p72_p1 = scmp.ne.s32.totalorder %s578_s0, %s574_s13 }
   0xb   : > { %p73_p2 = scmp.eq.s32.totalorder %s590_s16, 0  ;;  %p78_p3 = scmp.ne.s32.totalorder %s574_s13, %s570_s12 }
   0xc   : > { %s793_s19 = smov (%p37_p0, %s35_s19), 0  ;;  %p79_p5 = scmp.eq.s32.totalorder %s368_s17, 0 }
   0xd   : > { %p656_p4 = por %p73_p2, %p72_p1  ;;  %s60_s22 = ssub.s32 %s586_s15, %s793_s19 }
   0xe   : > { %p132_p6 = scmp.eq.s32.totalorder %s368_s17, 7  ;;  %p63_p7 = scmp.eq.s32.totalorder %s60_s22, 0 }
   0xf   : > { %p662_p8 = por %p79_p5, %p78_p3  ;;  %p138_p10 = scmp.eq.s32.totalorder %s369_s18, 7 }
  0x10   : > { %p666_p9 = por %p132_p6, %p72_p1  ;;  %p400_p12 = scmp.lt.s32.totalorder %s590_s16, 8 }
  0x11   : > { %s671_s25 = scalar_select %p63_p7, %s578_s0, %s65_s20  }
  0x12   : > { %p673_p11 = por %p138_p10, %p78_p3  ;;  %s679_s27 = sand.u32 1, %s578_s0  }
  0x13   : > { %s372_s28 = sshll.u32 %s679_s27, 1  ;;  %s373_s29 = sshll.u32 %s586_s15, 5 }
  0x14   : > { %s171_s5 = scalar_lea.hbm %s778_s1, %s373_s29  ;;  %s165_s6 = scalar_lea.vmem [#allocation3], %s372_s28 }
  0x15   : > { %s173_s7 = sshll.u32 %s165_s6, 4  ;;  %p688_p13 = pnand %p400_p12, %p656_p4  ;;  %s174_s7 = int_to_ptr.vmem [resolvable:$true] %s173_s7 }
  0x16   : > { %p375_p0 = scmp.ge.s32.totalorder %s590_s16, 1  ;;  %p196_p1 = scmp.lt.s32.totalorder %s590_s16, 9 }
  0x17   : > { %s162_s9 = scalar_lea.sflag [#allocation4], %s679_s27  ;;  %p452_p2 = pneg %p688_p13 }
  0x18   : > { %s463_s10 = scalar_lea.vmem %s174_s7, 32  ;;  %s592_s11 = smov [#allocation3]  }
  0x19   : > { %p464_p3 = scmp.ne.s32.totalorder %s174_s7, %s463_s10  ;;  %s468_s17 = sshll.u32 %s592_s11, 4  ;;  %s469_s17 = int_to_ptr.vmem [resolvable:$false] %s468_s17 }
  0x1a   : > { %s470_s18 = scalar_lea.vmem %s469_s17, 64  ;;  %p471_p4 = scmp.lt.s32.totalorder %s174_s7, %s469_s17 }
  0x1b   : > { %p466_p5 = pnand %p464_p3, %p452_p2  ;;  %p472_p7 = scmp.lt.s32.totalorder %s470_s18, %s463_s10 }
  0x1d   : > { %p467_p6 = pneg %p466_p5  ;;  %p473_p10 = por %p472_p7, %p471_p4 }
  0x1f   : > { %p474_p12 = pnand %p473_p10, %p467_p6 }
  0x21   : > { %477 = shalt.err (!%p474_p12)
}
  0x22   : > { %392 = dma.hbm_to_vmem [thread:$0]  (!%p688_p13), %s171_s5, 32, %s174_s7, %s162_s9  }
  0x23   : > { %p706_p3 = pnand %p375_p0, %p196_p1  ;;  %s374_s21 = sshll.u32 %s586_s15, 4 }
  0x24   : > { %s183_s22 = scalar_lea.vmem [#allocation6], %s679_s27  ;;  %s189_s4 = scalar_lea.hbm %s779_s2, %s374_s21 }
  0x25   : > { %s191_s28 = sshll.u32 %s183_s22, 4  ;;  %s181_s6 = scalar_lea.sflag [#allocation7], %s679_s27  ;;  %s192_s28 = int_to_ptr.vmem [resolvable:$true] %s191_s28 }
  0x26   : > { %s491_s10 = scalar_lea.vmem %s192_s28, 16  ;;  %s593_s5 = smov [#allocation6]  }
  0x27   : > { %p492_p5 = scmp.ne.s32.totalorder %s192_s28, %s491_s10  ;;  %s496_s7 = sshll.u32 %s593_s5, 4  ;;  %s497_s7 = int_to_ptr.vmem [resolvable:$false] %s496_s7 }
  0x28   : > { %s498_s9 = scalar_lea.vmem %s497_s7, 32  ;;  %p499_p0 = scmp.lt.s32.totalorder %s192_s28, %s497_s7 }
  0x29   : > { %p494_p6 = pnand %p492_p5, %p452_p2  ;;  %p500_p1 = scmp.lt.s32.totalorder %s498_s9, %s491_s10 }
  0x2b   : > { %p495_p4 = pneg %p494_p6  ;;  %p501_p7 = por %p500_p1, %p499_p0 }
  0x2d   : > { %p502_p10 = pnand %p501_p7, %p495_p4 }
  0x2f   : > { %505 = shalt.err (!%p502_p10)
}
  0x30   : > { %395 = dma.hbm_to_vmem [thread:$0]  (!%p688_p13), %s189_s4, 16, %s192_s28, %s181_s6  }
  0x31   : > { %200 = sbr.rel (%p706_p3) target bundleno = 81 (0x51), region = 32  ;;  %s724_s27 = sand.u32 (!%p706_p3), 1, %s574_s13  }
  0x32   : > { %s376_s11 = sshll.u32 (!%p706_p3), %s724_s27, 1  ;;  %s203_s17 = scalar_lea.sflag (!%p706_p3), [#allocation4], %s724_s27 }
  0x33   : > { %s206_s18 = scalar_lea.vmem (!%p706_p3), [#allocation3], %s376_s11 }
  0x36   : > { %557 = dma.done.wait (%p662_p8), %s203_s17, 32  }
  0x37   : > { %559 = vsyncadd (%p662_p8), %s203_s17, 4294967264  ;;  %s212_s8 = scalar_lea.sflag [#allocation7], %s724_s27  ;;  %s214_s20 = scalar_lea.vmem [#allocation6], %s724_s27 }
  0x38   : > { %561 = dma.done.wait (%p662_p8), %s212_s8, 16  }
  0x39   : > { %563 = vsyncadd (%p662_p8), %s212_s8, 4294967280  ;;  %s240_s21 = scalar_lea.vmem [#allocation8], %s376_s11  ;;  %s380_s28 = sshll.u32 %s582_s14, 5  ;;  %v241_v0 = vld [vmem:[%s206_s18] sm:$0x3]  ;;  %vm250_vm0 = vcmask 254976  }
  0x3a   : > { %s267_s22 = sshll.u32 %s240_s21, 4  ;;  %v378_v1 = vld [vmem:[%s214_s20] ss:$0 sm:$0xff]  ;;  %s265_s4 = scalar_lea.hbm %s780_s3, %s380_s28  ;;  %s268_s22 = int_to_ptr.vmem [resolvable:$true] %s267_s22 }
  0x3b   : > { %v249_v2 = vadd.f32 %v378_v1, %v241_v0  ;;  %s253_s6 = scalar_lea.sflag [#allocation5], %s724_s27  ;;  %s506_s10 = scalar_lea.vmem %s268_s22, 32 }
  0x3c   : > { %p507_p13 = scmp.ne.s32.totalorder %s268_s22, %s506_s10  ;;  %s594_s23 = smov [#allocation8]  }
  0x3d   : > { %251 = vst.msk [vmem:[%s240_s21] sm:$0x3] %vm250_vm0, %v249_v2  ;;  %s510_s5 = sshll.u32 %s594_s23, 4  ;;  %s511_s5 = int_to_ptr.vmem [resolvable:$false] %s510_s5 }
  0x3e   : > { %p508_p8 = pnand %p507_p13, %p666_p9  ;;  %s512_s14 = scalar_lea.vmem %s511_s5, 64 }
  0x3f   : > { %p513_p12 = scmp.lt.s32.totalorder %s268_s22, %s511_s5  ;;  %p514_p3 = scmp.lt.s32.totalorder %s512_s14, %s506_s10 }
  0x40   : > { %p509_p2 = pneg %p508_p8 }
  0x41   : > { %p515_p5 = por %p514_p3, %p513_p12 }
  0x43   : > { %p516_p6 = pnand %p515_p5, %p509_p2 }
  0x45   : > { %519 = shalt.err (!%p516_p6)
}
  0x46   : > { %s520_s7 = scalar_lea.hbm %s265_s4, 32  ;;  %s524_s11 = scalar_lea.hbm %s780_s3, 256 }
  0x47   : > { %p521_p4 = scmp.ne.s32.totalorder %s265_s4, %s520_s7  ;;  %p525_p7 = scmp.lt.s32.totalorder %s265_s4, %s780_s3 }
  0x48   : > { %p526_p10 = scmp.lt.s32.totalorder %s524_s11, %s520_s7 }
  0x49   : > { %p522_p0 = pnand %p521_p4, %p666_p9 }
  0x4a   : > { %p527_p13 = por %p526_p10, %p525_p7 }
  0x4b   : > { %p523_p1 = pneg %p522_p0 }
  0x4d   : > { %p528_p8 = pnand %p527_p13, %p523_p1 }
  0x4f   : > { %531 = shalt.err (!%p528_p8)
}
  0x50   : > { %387 = dma.vmem_to_hbm [thread:$0]  (%p666_p9), %s268_s22, 32, %s265_s4, %s253_s6  }
  0x51 PF: > { %p401_p2 = scmp.ge.s32.totalorder %s590_s16, 2  ;;  %s279_s8 = sand.u32 1, %s570_s12  }
  0x52   : > { %s280_s20 = scalar_lea.sflag [#allocation5], %s279_s8 }
  0x53   : > { %p397_p12 = pnand %p401_p2, %p673_p11 }
  0x55   : > { %p398_p3 = pneg %p397_p12 }
  0x57   : > { %565 = dma.done.wait (%p398_p3), %s280_s20, 32  }
  0x58   : > { %567 = vsyncadd (%p398_p3), %s280_s20, 4294967264  ;;  %s23_s16 = sadd.s32 1, %s590_s16   ;;  %s787_s12 = smov %s574_s13 }
  0x59   : > { %p20_p5 = scmp.ge.s32.totalorder %s23_s16, 10   ;;  %s788_s13 = smov %s578_s0 }
  0x5a   : > { %s789_s0 = smov %s671_s25  ;;  %s790_s14 = smov %s586_s15 }
  0x5b   : > { %s791_s15 = smov %s793_s19  ;;  %22 = sbr.rel (!%p20_p5) target bundleno = 8 (0x8), region = 90 }
  0x60   :  { %285 = vsyncpa [#allocation4], 1 }
  0x61   :  { %287 = vsyncpa [#allocation4 + $0x1], 1 }
  0x62   :  { %288 = vsyncpa [#allocation7], 1 }
  0x63   :  { %290 = vsyncpa [#allocation7 + $0x1], 1 }
  0x64   :  { %291 = vsyncpa [#allocation5], 1 }
  0x65   :  { %293 = vsyncpa [#allocation5 + $0x1], 1 }

</bundles_post_ra>
